<compile_context>
chip_gen: v7x
topology: tpu7x:2x2x1
jax: 0.10.0
libtpu: 0.0.40
codegen_flags: <defaults>
</compile_context>

<pallas_src>
import numpy as np
import jax
import jax.numpy as jnp
from jax.experimental import pallas as pl
from jax.experimental.pallas import tpu as pltpu


# --------------------------------------------------------------------------------------
# Kernel: elementwise hard-swish on a (tile_rows, lane_width) block
# --------------------------------------------------------------------------------------
def hswish_kernel(x_ref, o_ref):
    x = x_ref[...].astype(jnp.float32)
    # x * relu6(x + 3) / 6  ==  x * clip(x + 3, 0, 6) * (1/6)
    o_ref[...] = (x * jnp.clip(x + 3.0, 0.0, 6.0) * (1.0 / 6.0)).astype(o_ref.dtype)


def _sublane_multiple(dtype) -> int:
    # Native second-to-last-dim packing: f32 -> 8, bf16/f16 -> 16, int8/fp8 -> 32.
    return {4: 8, 2: 16, 1: 32}.get(np.dtype(dtype).itemsize, 8)


# --------------------------------------------------------------------------------------
# Wrapper: flatten -> lane-dense (rows, lane_width) layout -> row-tiled grid -> restore
# --------------------------------------------------------------------------------------
def hswish_pallas(x, *, max_lane_width=1024, max_tile_rows=1024):
    """Hswish over an arbitrarily shaped array via a lane-dense Pallas kernel.

    max_lane_width: upper bound on the last-dim width of the internal 2D layout
                    (multiple of 128).  The wrapper picks the largest divisor of
                    the element count that is a multiple of 128 and <= this.
    max_tile_rows:  rows per grid step upper bound (1024 is v7x-VMEM-safe; on
                    v6e/v5e sweeping up to 2048 is a small additional win).
    """
    assert max_lane_width % 128 == 0
    orig_shape, orig_dtype = x.shape, x.dtype
    total = int(np.prod(orig_shape))
    if total == 0:
        return x

    flat = x.reshape(-1)

    # ---- choose a lane-dense layout that avoids any padding when possible ----
    lane_width = 0
    for cand in range(max_lane_width, 0, -128):
        if total % cand == 0:
            lane_width = cand
            break

    padded = False
    if lane_width == 0:
        # total not a multiple of 128: pad only up to the next row boundary
        # (< lane_width elements).  hswish(0) == 0, so zero padding is invariant.
        lane_width = max_lane_width
        rows = -(-total // lane_width)
        flat = jnp.pad(flat, (0, rows * lane_width - total))
        padded = True
    else:
        rows = total // lane_width

    x2d = flat.reshape(rows, lane_width)

    # ---- row-tile size ----
    sub = _sublane_multiple(orig_dtype)
    tile_rows = min(max_tile_rows, rows)
    if rows > sub:
        # Keep >= 2 grid steps so the "parallel" axis can shard across both
        # TensorCores on v7x; round up to the dtype's native sublane multiple.
        tile_rows = min(tile_rows, -(-rows // 2))
        tile_rows = -(-tile_rows // sub) * sub
    else:
        # Tiny input: full-extent block (legal even below the native sublane count).
        tile_rows = rows

    grid = (pl.cdiv(rows, tile_rows),)  # ragged last block handled by Pallas masking

    # VMEM budget: (in + out) x 2 pipeline buffers + headroom; never v7x's full 64 MiB.
    block_bytes = tile_rows * lane_width * np.dtype(orig_dtype).itemsize
    vmem_limit = int(min(max(4 * block_bytes + (8 << 20), 24 << 20), 48 << 20))

    out2d = pl.pallas_call(
        hswish_kernel,
        out_shape=jax.ShapeDtypeStruct((rows, lane_width), orig_dtype),
        grid_spec=pltpu.PrefetchScalarGridSpec(
            num_scalar_prefetch=0,
            grid=grid,
            in_specs=[pl.BlockSpec((tile_rows, lane_width), lambda i: (i, 0))],
            out_specs=pl.BlockSpec((tile_rows, lane_width), lambda i: (i, 0)),
        ),
        compiler_params=pltpu.CompilerParams(
            dimension_semantics=("parallel",),
            vmem_limit_bytes=vmem_limit,
        ),
    )(x2d)

    out_flat = out2d.reshape(-1)
    if padded:
        out_flat = out_flat[:total]
    return out_flat.reshape(orig_shape)


# --------------------------------------------------------------------------------------
# Module-style wrapper matching the PyTorch Hswish interface
# --------------------------------------------------------------------------------------
class HswishPallas:
    def __init__(self, inplace=True):
        # `inplace` has no meaning for a functional JAX kernel; kept for API parity.
        self.inplace = inplace

    def __call__(self, x):
        return hswish_pallas(x)


# --------------------------------------------------------------------------------------
# Pure-JAX reference for correctness checking
# --------------------------------------------------------------------------------------
def hswish_reference(x):
    xf = x.astype(jnp.float32)
    return (xf * jnp.clip(xf + 3.0, 0.0, 6.0) / 6.0).astype(x.dtype)


if __name__ == "__main__":
    mod = HswishPallas(inplace=True)

    # Main check: NCHW (2, 4, 16, 16) — 128-divisible => zero-copy (no pad) path.
    N, C, H, W = 2, 4, 16, 16
    x = jax.random.normal(jax.random.PRNGKey(0), (N, C, H, W), dtype=jnp.float32) * 4.0
    out = jax.block_until_ready(mod(x))
    ref = jax.block_until_ready(hswish_reference(x))
    np.testing.assert_allclose(np.asarray(out), np.asarray(ref), rtol=1e-5, atol=1e-5)
    assert out.shape == (N, C, H, W) and out.dtype == x.dtype

    # Secondary check: non-128-divisible size exercises the (rare) padded tail path.
    x_odd = jax.random.normal(jax.random.PRNGKey(0), (3, 5, 7), dtype=jnp.float32) * 4.0
    out_odd = jax.block_until_ready(mod(x_odd))
    np.testing.assert_allclose(
        np.asarray(out_odd), np.asarray(hswish_reference(x_odd)), rtol=1e-5, atol=1e-5
    )
    assert out_odd.shape == (3, 5, 7) and out_odd.dtype == x_odd.dtype

    print("KERNEL_OK")
</pallas_src>

<mosaic_0001>
module attributes {stable_mosaic.version = 11 : i64} {
  func.func @hswish_kernel(%arg0: i32, %arg1: memref<2x1024xf32, #tpu.memory_space<vmem>>, %arg2: memref<2x1024xf32, #tpu.memory_space<vmem>>) attributes {dimension_semantics = [#tpu.dimension_semantics<parallel>], iteration_bounds = array<i64: 1>, scalar_prefetch = 0 : i64, scratch_operands = 0 : i64, tpu.core_type = #tpu.core_type<tc>, window_params = [{transform_indices = @transform_0, window_bounds = array<i64: 2, 1024>}, {transform_indices = @transform_1, window_bounds = array<i64: 2, 1024>}]} {
    %c0 = arith.constant 0 : index
    %c0_0 = arith.constant 0 : index
    %0 = vector.load %arg1[%c0, %c0_0] : memref<2x1024xf32, #tpu.memory_space<vmem>>, vector<2x1024xf32>
    %cst = arith.constant 3.000000e+00 : f32
    %1 = vector.broadcast %cst : f32 to vector<2x1024xf32>
    %2 = arith.addf %0, %1 : vector<2x1024xf32>
    %cst_1 = arith.constant 0.000000e+00 : f32
    %cst_2 = arith.constant 6.000000e+00 : f32
    %3 = vector.broadcast %cst_1 : f32 to vector<2x1024xf32>
    %4 = arith.maximumf %3, %2 : vector<2x1024xf32>
    %5 = vector.broadcast %cst_2 : f32 to vector<2x1024xf32>
    %6 = arith.minimumf %5, %4 : vector<2x1024xf32>
    %7 = arith.mulf %0, %6 : vector<2x1024xf32>
    %cst_3 = arith.constant 0.166666672 : f32
    %8 = vector.broadcast %cst_3 : f32 to vector<2x1024xf32>
    %9 = arith.mulf %7, %8 : vector<2x1024xf32>
    %c0_4 = arith.constant 0 : index
    %c0_5 = arith.constant 0 : index
    %10 = vector.load %arg2[%c0_4, %c0_5] : memref<2x1024xf32, #tpu.memory_space<vmem>>, vector<2x1024xf32>
    tpu.vector_store %arg2[%c0_4, %c0_5], %9 {strides = array<i32>} : memref<2x1024xf32, #tpu.memory_space<vmem>>, vector<2x1024xf32>,
    return
  }
  func.func @transform_0(%arg0: i32) -> (i32, i32) {
    %c0_i32 = arith.constant 0 : i32
    %c0_i32_0 = arith.constant 0 : i32
    return %arg0, %c0_i32 : i32, i32
  }
  func.func @transform_1(%arg0: i32) -> (i32, i32) {
    %c0_i32 = arith.constant 0 : i32
    %c0_i32_0 = arith.constant 0 : i32
    return %arg0, %c0_i32 : i32, i32
  }
}

</mosaic_0001>

<bundles_post_ra>
// kernel: tpu_custom_call.1
= control target key start
LH: loop header
LB: loop body
LE: loop exit
PB: predicated region body
PF: predicated region fallthrough
CT: control target
= control target key end

     0   :  { %6 = vsyncpa [#allocation3], 0  ;;  %s136_s0 = inlined_call_operand.hbm [shape: f32[2,1024], index: 0, kind: input, shape index: {}]   ;;  %s137_s1 = inlined_call_operand.hbm [shape: f32[2,1024], index: 1, kind: output, shape index: {}]  }
   0x1   :  { %7 = vsyncpa [#allocation4], 0  ;;  %s100_s6 = smov [#allocation2]   ;;  %s52_s10 = scalar_lea.hbm %s136_s0, 256 }
   0x2   :  { %s14_s7 = sshll.u32 %s100_s6, 4  ;;  %p53_p0 = scmp.ne.s32.totalorder %s136_s0, %s52_s10  ;;  %s15_s7 = int_to_ptr.vmem [resolvable:$true] %s14_s7 }
   0x3   :  { %p56_p1 = scmp.lt.u32.totalorder %s52_s10, %s136_s0 }
   0x5   :  { %p58_p2 = pnand %p56_p1, %p53_p0 }
   0x7   :  { %61 = shalt.err (!%p58_p2)
}
   0x8   :  { %s62_s15 = scalar_lea.vmem %s15_s7, 256  ;;  %p67_p4 = scmp.lt.s32.totalorder %s15_s7, %s15_s7 }
   0x9   :  { %p63_p3 = scmp.ne.s32.totalorder %s15_s7, %s62_s15  ;;  %p68_p5 = scmp.lt.s32.totalorder %s62_s15, %s62_s15 }
   0xb   :  { %p69_p6 = por %p68_p5, %p67_p4 }
   0xd   :  { %p70_p7 = pnand %p69_p6, %p63_p3 }
   0xf   :  { %73 = shalt.err (!%p70_p7)
}
  0x10   :  { %17 = dma.hbm_to_vmem [thread:$0]  %s136_s0, 256, %s15_s7, [#allocation3]  }
  0x11   :  { %96 = dma.done.wait [#allocation3], 256  }
  0x12   :  { %97 = vsyncadd [#allocation3], 4294967040  ;;  %v21_v0 = vld [vmem:[#allocation2] sm:$0xff]  ;;  %v22_v1 = vld [vmem:[#allocation2 + $0x8] sm:$0xff]  ;;  %s101_s18 = smov [#allocation5]  }
  0x13   :  { %v23_v2 = vadd.f32 3.0, %v21_v0  ;;  %v24_v3 = vadd.f32 3.0, %v22_v1  ;;  %s41_s19 = sshll.u32 %s101_s18, 4  ;;  %s42_s19 = int_to_ptr.vmem [resolvable:$true] %s41_s19 }
  0x14   :  { %s74_s0 = scalar_lea.vmem %s42_s19, 256  ;;  %p79_p9 = scmp.lt.s32.totalorder %s42_s19, %s42_s19 }
  0x15   :  { %v25_v4 = vmax.f32 %v23_v2, 0.0  ;;  %v26_v5 = vmax.f32 %v24_v3, 0.0  ;;  %p75_p8 = scmp.ne.s32.totalorder %s42_s19, %s74_s0  ;;  %p80_p10 = scmp.lt.s32.totalorder %s74_s0, %s74_s0 }
  0x17   :  { %v27_v6 = vmin.f32 %v25_v4, 6.0  ;;  %v28_v7 = vmin.f32 %v26_v5, 6.0  ;;  %p81_p11 = por %p80_p10, %p79_p9 }
  0x19   :  { %v29_v8 = vmul.f32 %v27_v6, %v21_v0  ;;  %v30_v9 = vmul.f32 %v28_v7, %v22_v1  ;;  %p82_p12 = pnand %p81_p11, %p75_p8 }
  0x1b   :  { %v31_v10 = vmul.f32 0.16666667, %v29_v8  ;;  %v32_v11 = vmul.f32 0.16666667, %v30_v9 }
  0x1d   :  { %33 = vst [vmem:[#allocation5] sm:$0xff] %v31_v10  ;;  %34 = vst [vmem:[#allocation5 + $0x8] sm:$0xff] %v32_v11 }
  0x1e   :  { %85 = shalt.err (!%p82_p12)
}
  0x1f   :  { %s86_s22 = scalar_lea.hbm %s137_s1, 256 }
  0x20   :  { %p87_p13 = scmp.ne.s32.totalorder %s137_s1, %s86_s22  ;;  %p90_p0 = scmp.lt.u32.totalorder %s86_s22, %s137_s1 }
  0x22   :  { %p92_p1 = pnand %p90_p0, %p87_p13 }
  0x24   :  { %95 = shalt.err (!%p92_p1)
}
  0x25   :  { %44 = dma.vmem_to_hbm [thread:$0]  %s42_s19, 256, %s137_s1, [#allocation4]  }
  0x26   :  { %98 = dma.done.wait [#allocation4], 256  }
  0x27   :  { %99 = vsyncadd [#allocation4], 4294967040 }
  0x28   :  { %48 = vsyncpa [#allocation3], 1 }
  0x29   :  { %49 = vsyncpa [#allocation4], 1 }

</bundles_post_ra>
